<compile_context>
chip_gen: v5e
topology: v5e:2x2
jax: 0.10.0
libtpu: 0.0.40
codegen_flags: <defaults>
</compile_context>

<pallas_src>
import math

import jax
import jax.numpy as jnp
from jax.experimental import pallas as pl
from jax.experimental.pallas import tpu as pltpu


def _wave_fused_kernel(x_ref, w_ref, b_ref, ll_ref, lh_ref):
    # One MXU matmul covers: stride-2 Haar conv (both branches), phi scale,
    # and the shared Linear(64, 128).  Single bias broadcast-add in the f32
    # accumulator.
    res = jnp.dot(x_ref[...], w_ref[...], preferred_element_type=jnp.float32)
    res = res + b_ref[...]                     # (1, 256) broadcast, done once
    ll_ref[...] = res[:, :128]                 # lane-tile-aligned slices
    lh_ref[...] = res[:, 128:]


def fuse_wave_params(w_t, bias, phi):
    """Fold de-interleave + Haar combine + phi/sqrt(2) + shared Linear into
    one (128, 256) weight and a (1, 256) bias.

    w_t: (64, 128) = Linear.weight.T, bias: (128,).
      row 2j   of W_fused = [ c*wt[j] |  c*wt[j] ]
      row 2j+1 of W_fused = [ c*wt[j] | -c*wt[j] ]
    so tgt2 @ W_fused = [ c*(xe+xo) @ wt | c*(xe-xo) @ wt ] = [ ll | lh ].
    """
    c = phi / math.sqrt(2.0)
    cw = c * w_t                                          # (64, 128)
    w_even = jnp.concatenate([cw, cw], axis=1)            # (64, 256)
    w_odd = jnp.concatenate([cw, -cw], axis=1)            # (64, 256)
    w_fused = jnp.stack([w_even, w_odd], axis=1).reshape(128, 256)
    b_fused = jnp.concatenate([bias, bias]).reshape(1, 256)
    return w_fused, b_fused


def _choose_batch_tile(B):
    """Pick a batch tile: multiple of 8, capped at 2048 rows (~1 MiB f32 per
    buffer -> ~6 MiB double-buffered total, well under the 32 MiB default
    scoped VMEM on v5e/v6e/v7x).  For large B keep the grid at >= ~8 steps so
    v7x's two TensorCores each get several pipelined steps."""
    if B <= 8:
        return B                      # single block == full array extent
    target = pl.cdiv(B, 8)            # aim for ~8 grid steps
    target = ((target + 7) // 8) * 8  # sublane-align (multiple of 8)
    return max(8, min(2048, target))


def wave_layer_forward(tgt2, w_fused, b_fused):
    """tgt2: (B, 128) f32; w_fused: (128, 256) f32; b_fused: (1, 256) f32.
    Returns (ll, lh), each (B, 128) f32."""
    B, L = tgt2.shape
    assert L == 128, "WaveLayer expects seq length 128 (Linear(64, 128))"

    bm = _choose_batch_tile(B)
    grid = (pl.cdiv(B, bm),)          # ragged last block is masked by Pallas

    out_shape = (
        jax.ShapeDtypeStruct((B, 128), jnp.float32),
        jax.ShapeDtypeStruct((B, 128), jnp.float32),
    )

    return pl.pallas_call(
        _wave_fused_kernel,
        out_shape=out_shape,
        grid=grid,
        in_specs=[
            pl.BlockSpec((bm, 128), lambda i: (i, 0)),   # activations: tiled
            pl.BlockSpec((128, 256), lambda i: (0, 0)),  # fused weight: resident
            pl.BlockSpec((1, 256), lambda i: (0, 0)),    # fused bias: resident
        ],
        out_specs=(
            pl.BlockSpec((bm, 128), lambda i: (i, 0)),
            pl.BlockSpec((bm, 128), lambda i: (i, 0)),
        ),
        compiler_params=pltpu.CompilerParams(
            dimension_semantics=("parallel",),           # megacore on v7x
        ),
    )(tgt2, w_fused, b_fused)


def _reference(tgt2, w_t, bias, phi):
    c = phi / math.sqrt(2.0)
    xr = tgt2.reshape(tgt2.shape[0], -1, 2)
    ll = c * (xr[:, :, 0] + xr[:, :, 1])
    lh = c * (xr[:, :, 0] - xr[:, :, 1])
    return ll @ w_t + bias, lh @ w_t + bias


if __name__ == "__main__":
    key = jax.random.PRNGKey(0)
    k_x, k_w, k_b = jax.random.split(key, 3)

    B, L = 2, 128           # batch=2, seq=128 (pooled to 64, Linear(64, 128))
    phi = 1.0

    tgt2 = jax.random.normal(k_x, (B, L), dtype=jnp.float32)

    # Deterministic Linear(64, 128) params (xavier-uniform-like scale).
    fan_in, fan_out = 64, 128
    limit = math.sqrt(6.0 / (fan_in + fan_out))
    w = jax.random.uniform(
        k_w, (fan_out, fan_in), minval=-limit, maxval=limit, dtype=jnp.float32
    )                                   # PyTorch Linear.weight shape (128, 64)
    w_t = w.T                           # (64, 128) used as x @ w_t
    bias = jax.random.uniform(
        k_b, (fan_out,),
        minval=-1.0 / math.sqrt(fan_in), maxval=1.0 / math.sqrt(fan_in),
        dtype=jnp.float32,
    )

    # One-time parameter fusion (init/jit-time constant).
    w_fused, b_fused = fuse_wave_params(w_t, bias, phi)

    ll, lh = wave_layer_forward(tgt2, w_fused, b_fused)
    jax.block_until_ready((ll, lh))

    ll_ref, lh_ref = _reference(tgt2, w_t, bias, phi)
    assert jnp.allclose(ll, ll_ref, atol=1e-4, rtol=1e-4)
    assert jnp.allclose(lh, lh_ref, atol=1e-4, rtol=1e-4)

    # TODO(synk): nn.Dropout / InstanceNorm1d / LayerNorm / activation are
    # constructed in __init__ but unused in forward_post, so not implemented.
    print("KERNEL_OK")
</pallas_src>

<mosaic_0001>
module attributes {stable_mosaic.version = 11 : i64} {
  func.func @_wave_fused_kernel(%arg0: i32, %arg1: memref<2x128xf32, #tpu.memory_space<vmem>>, %arg2: memref<128x256xf32, #tpu.memory_space<vmem>>, %arg3: memref<1x256xf32, #tpu.memory_space<vmem>>, %arg4: memref<2x128xf32, #tpu.memory_space<vmem>>, %arg5: memref<2x128xf32, #tpu.memory_space<vmem>>) attributes {dimension_semantics = [#tpu.dimension_semantics<parallel>], iteration_bounds = array<i64: 1>, scalar_prefetch = 0 : i64, scratch_operands = 0 : i64, tpu.core_type = #tpu.core_type<tc>, window_params = [{transform_indices = @transform_0, window_bounds = array<i64: 2, 128>}, {pipeline_mode = #tpu.pipeline_mode<synchronous>, transform_indices = @transform_1, window_bounds = array<i64: 128, 256>}, {pipeline_mode = #tpu.pipeline_mode<synchronous>, transform_indices = @transform_2, window_bounds = array<i64: 1, 256>}, {transform_indices = @transform_3, window_bounds = array<i64: 2, 128>}, {transform_indices = @transform_4, window_bounds = array<i64: 2, 128>}]} {
    %c0 = arith.constant 0 : index
    %c0_0 = arith.constant 0 : index
    %0 = vector.load %arg1[%c0, %c0_0] : memref<2x128xf32, #tpu.memory_space<vmem>>, vector<2x128xf32>
    %c0_1 = arith.constant 0 : index
    %c0_2 = arith.constant 0 : index
    %1 = vector.load %arg2[%c0_1, %c0_2] : memref<128x256xf32, #tpu.memory_space<vmem>>, vector<128x256xf32>
    %cst = arith.constant dense<0.000000e+00> : vector<2x256xf32>
    %2 = tpu.matmul %0, %1, %cst {dimension_numbers = #tpu.dot_dimension_numbers<[1], [0], [0], [1], [0, 0, 1, 1], [], []>} : vector<2x128xf32>, vector<128x256xf32>, vector<2x256xf32> -> vector<2x256xf32>
    %c0_3 = arith.constant 0 : index
    %c0_4 = arith.constant 0 : index
    %3 = vector.load %arg3[%c0_3, %c0_4] : memref<1x256xf32, #tpu.memory_space<vmem>>, vector<1x256xf32>
    %4 = vector.broadcast %3 : vector<1x256xf32> to vector<2x256xf32>
    %5 = arith.addf %2, %4 : vector<2x256xf32>
    %6 = vector.extract_strided_slice %5 {offsets = [0, 0], sizes = [2, 128], strides = [1, 1]} : vector<2x256xf32> to vector<2x128xf32>
    %c0_5 = arith.constant 0 : index
    %c0_6 = arith.constant 0 : index
    %7 = vector.load %arg4[%c0_5, %c0_6] : memref<2x128xf32, #tpu.memory_space<vmem>>, vector<2x128xf32>
    tpu.vector_store %arg4[%c0_5, %c0_6], %6 {strides = array<i32>} : memref<2x128xf32, #tpu.memory_space<vmem>>, vector<2x128xf32>,
    %8 = vector.extract_strided_slice %5 {offsets = [0, 128], sizes = [2, 128], strides = [1, 1]} : vector<2x256xf32> to vector<2x128xf32>
    %c0_7 = arith.constant 0 : index
    %c0_8 = arith.constant 0 : index
    %9 = vector.load %arg5[%c0_7, %c0_8] : memref<2x128xf32, #tpu.memory_space<vmem>>, vector<2x128xf32>
    tpu.vector_store %arg5[%c0_7, %c0_8], %8 {strides = array<i32>} : memref<2x128xf32, #tpu.memory_space<vmem>>, vector<2x128xf32>,
    return
  }
  func.func @transform_0(%arg0: i32) -> (i32, i32) {
    %c0_i32 = arith.constant 0 : i32
    %c0_i32_0 = arith.constant 0 : i32
    return %arg0, %c0_i32 : i32, i32
  }
  func.func @transform_1(%arg0: i32) -> (i32, i32) {
    %c0_i32 = arith.constant 0 : i32
    %c0_i32_0 = arith.constant 0 : i32
    %c0_i32_1 = arith.constant 0 : i32
    return %c0_i32, %c0_i32_0 : i32, i32
  }
  func.func @transform_2(%arg0: i32) -> (i32, i32) {
    %c0_i32 = arith.constant 0 : i32
    %c0_i32_0 = arith.constant 0 : i32
    %c0_i32_1 = arith.constant 0 : i32
    return %c0_i32, %c0_i32_0 : i32, i32
  }
  func.func @transform_3(%arg0: i32) -> (i32, i32) {
    %c0_i32 = arith.constant 0 : i32
    %c0_i32_0 = arith.constant 0 : i32
    return %arg0, %c0_i32 : i32, i32
  }
  func.func @transform_4(%arg0: i32) -> (i32, i32) {
    %c0_i32 = arith.constant 0 : i32
    %c0_i32_0 = arith.constant 0 : i32
    return %arg0, %c0_i32 : i32, i32
  }
}

</mosaic_0001>

<bundles_post_ra>
// kernel: tpu_custom_call.1
= control target key start
LH: loop header
LB: loop body
LE: loop exit
PB: predicated region body
PF: predicated region fallthrough
CT: control target
= control target key end

     0   :  { %10 = vsyncpa [#allocation3], 0  ;;  %s358_s0 = inlined_call_operand.hbm [shape: f32[2,128], index: 0, kind: input, shape index: {}]   ;;  %s359_s1 = inlined_call_operand.hbm [shape: f32[128,256], index: 1, kind: input, shape index: {}]   ;;  %s360_s2 = inlined_call_operand.hbm [shape: f32[1,256], index: 2, kind: input, shape index: {}]   ;;  %s361_s3 = inlined_call_operand.hbm [shape: f32[2,128], index: 3, kind: output, shape index: {0}]   ;;  %s362_s4 = inlined_call_operand.hbm [shape: f32[2,128], index: 4, kind: output, shape index: {1}]  }
   0x1   :  { %11 = vsyncpa [#allocation6], 0 }
   0x2   :  { %12 = vsyncpa [#allocation4], 0  ;;  %s29_s17 = sshll.u32 %s359_s1, 4  ;;  %s30_s17 = int_to_ptr.hbm [resolvable:$true] %s29_s17 }
   0x3   :  { %13 = vsyncpa [#allocation10], 0  ;;  %s311_s18 = smov [#allocation5]   ;;  %s19_s22 = sshll.u32 %s358_s0, 4  ;;  %s20_s22 = int_to_ptr.hbm [resolvable:$true] %s19_s22 }
   0x4   :  { %s31_s19 = sshll.u32 %s311_s18, 4  ;;  %s312_s23 = smov 256   ;;  %s32_s19 = int_to_ptr.vmem [resolvable:$true] %s31_s19 }
   0x5   :  { %s313_s24 = smov 16   ;;  %s314_s25 = smov [#allocation2]  }
   0x6   :  { %37 = dma.hbm_to_vmem [thread:$0]  %s30_s17, 4096, %s32_s19, [#allocation6], %s312_s23, %s312_s23, %s313_s24  }
   0x7   :  { %s21_s26 = sshll.u32 %s314_s25, 4  ;;  %s43_s29 = sshll.u32 %s360_s2, 4  ;;  %s22_s26 = int_to_ptr.vmem [resolvable:$true] %s21_s26  ;;  %s44_s29 = int_to_ptr.hbm [resolvable:$true] %s43_s29 }
   0x8   :  { %24 = dma.hbm_to_vmem [thread:$0]  %s20_s22, 32, %s22_s26, [#allocation3]  }
   0x9   :  { %s315_s1 = smov [#allocation7]  }
   0xa   :  { %s45_s30 = sshll.u32 %s315_s1, 4  ;;  %s46_s30 = int_to_ptr.vmem [resolvable:$true] %s45_s30 }
   0xb   :  { %48 = dma.hbm_to_vmem [thread:$0]  %s44_s29, 32, %s46_s30, [#allocation6]  }
   0xc   :  { %303 = dma.done.wait [#allocation3], 32  }
   0xd   :  { %304 = vsyncadd [#allocation3], 4294967264 }
   0xe   :  { %305 = dma.done.wait [#allocation6], 4128  }
   0xf   :  { %306 = vsyncadd [#allocation6], 4294963168  ;;  %v92_v0 = vld [vmem:[#allocation5 + $0xf0] sm:$0xff]  ;;  %v93_v1 = vld [vmem:[#allocation5 + $0xf8] sm:$0xff]  ;;  %s316_s0 = smov [#allocation8]   ;;  %s149_s7 = sshll.u32 %s361_s3, 4  ;;  %s150_s7 = int_to_ptr.hbm [resolvable:$true] %s149_s7 }
  0x10   :  { %v90_v2 = vld [vmem:[#allocation5 + $0xe0] sm:$0xff]  ;;  %100 = vmatpush.msra.mxu0 %v92_v0  ;;  %120 = vmatpush.msra.mxu1 %v93_v1  ;;  %v91_v3 = vld [vmem:[#allocation5 + $0xe8] sm:$0xff]  ;;  %v88_v4 = vld [vmem:[#allocation5 + $0xd0] sm:$0xff]  ;;  %s147_s2 = sshll.u32 %s316_s0, 4  ;;  %s317_s8 = smov [#allocation9]   ;;  %s148_s2 = int_to_ptr.vmem [resolvable:$true] %s147_s2 }
  0x11   :  { %v89_v5 = vld [vmem:[#allocation5 + $0xd8] sm:$0xff]  ;;  %v86_v6 = vld [vmem:[#allocation5 + $0xc0] sm:$0xff]  ;;  %v87_v7 = vld [vmem:[#allocation5 + $0xc8] sm:$0xff]  ;;  %s158_s9 = sshll.u32 %s317_s8, 4  ;;  %s160_s12 = sshll.u32 %s362_s4, 4  ;;  %s159_s9 = int_to_ptr.vmem [resolvable:$true] %s158_s9  ;;  %s161_s12 = int_to_ptr.hbm [resolvable:$true] %s160_s12 }
  0x12   :  { %101 = vmatpush.msra.mxu0 %v90_v2  ;;  %121 = vmatpush.msra.mxu1 %v91_v3  ;;  %v84_v8 = vld [vmem:[#allocation5 + $0xb0] sm:$0xff]  ;;  %v85_v9 = vld [vmem:[#allocation5 + $0xb8] sm:$0xff]  ;;  %v82_v10 = vld [vmem:[#allocation5 + $0xa0] sm:$0xff] }
  0x13   :  { %v83_v11 = vld [vmem:[#allocation5 + $0xa8] sm:$0xff]  ;;  %v80_v12 = vld [vmem:[#allocation5 + $0x90] sm:$0xff]  ;;  %v81_v13 = vld [vmem:[#allocation5 + $0x98] sm:$0xff] }
  0x14   :  { %102 = vmatpush.msra.mxu0 %v88_v4  ;;  %122 = vmatpush.msra.mxu1 %v89_v5  ;;  %v78_v14 = vld [vmem:[#allocation5 + $0x80] sm:$0xff]  ;;  %v79_v15 = vld [vmem:[#allocation5 + $0x88] sm:$0xff]  ;;  %v76_v16 = vld [vmem:[#allocation5 + $0x70] sm:$0xff] }
  0x15   :  { %v77_v17 = vld [vmem:[#allocation5 + $0x78] sm:$0xff]  ;;  %v74_v18 = vld [vmem:[#allocation5 + $0x60] sm:$0xff]  ;;  %v75_v19 = vld [vmem:[#allocation5 + $0x68] sm:$0xff] }
  0x16   :  { %103 = vmatpush.msra.mxu0 %v86_v6  ;;  %123 = vmatpush.msra.mxu1 %v87_v7  ;;  %v72_v20 = vld [vmem:[#allocation5 + $0x50] sm:$0xff]  ;;  %v73_v21 = vld [vmem:[#allocation5 + $0x58] sm:$0xff]  ;;  %v70_v22 = vld [vmem:[#allocation5 + $0x40] sm:$0xff] }
  0x17   :  { %v71_v23 = vld [vmem:[#allocation5 + $0x48] sm:$0xff]  ;;  %v68_v24 = vld [vmem:[#allocation5 + $0x30] sm:$0xff]  ;;  %v69_v25 = vld [vmem:[#allocation5 + $0x38] sm:$0xff] }
  0x18   :  { %104 = vmatpush.msra.mxu0 %v84_v8  ;;  %124 = vmatpush.msra.mxu1 %v85_v9  ;;  %v66_v26 = vld [vmem:[#allocation5 + $0x20] sm:$0xff]  ;;  %v67_v27 = vld [vmem:[#allocation5 + $0x28] sm:$0xff]  ;;  %v64_v28 = vld [vmem:[#allocation5 + $0x10] sm:$0xff] }
  0x19   :  { %v65_v29 = vld [vmem:[#allocation5 + $0x18] sm:$0xff]  ;;  %v62_v30 = vld [vmem:[#allocation5] sm:$0xff]  ;;  %v63_v31 = vld [vmem:[#allocation5 + $0x8] sm:$0xff] }
  0x1a   :  { %105 = vmatpush.msra.mxu0 %v82_v10  ;;  %125 = vmatpush.msra.mxu1 %v83_v11  ;;  %v61_v32 = vld [vmem:[#allocation2] sm:$0x3]  ;;  %v94_v33 = vld [vmem:[#allocation7] sm:$0x3] }
  0x1b   :  { %v96_v34 = vperm.slane %v94_v33, 0  ;;  %v97_v35 = vperm.slane %v94_v33, 1 }
  0x1c   :  { %106 = vmatpush.msra.mxu0 %v80_v12  ;;  %126 = vmatpush.msra.mxu1 %v81_v13 }
  0x1e   :  { %107 = vmatpush.msra.mxu0 %v78_v14  ;;  %127 = vmatpush.msra.mxu1 %v79_v15 }
  0x20   :  { %108 = vmatpush.msra.mxu0 %v76_v16  ;;  %128 = vmatpush.msra.mxu1 %v77_v17 }
  0x22   :  { %109 = vmatpush.msra.mxu0 %v74_v18  ;;  %129 = vmatpush.msra.mxu1 %v75_v19 }
  0x24   :  { %110 = vmatpush.msra.mxu0 %v72_v20  ;;  %130 = vmatpush.msra.mxu1 %v73_v21 }
  0x26   :  { %111 = vmatpush.msra.mxu0 %v70_v22  ;;  %131 = vmatpush.msra.mxu1 %v71_v23 }
  0x28   :  { %112 = vmatpush.msra.mxu0 %v68_v24  ;;  %132 = vmatpush.msra.mxu1 %v69_v25 }
  0x2a   :  { %113 = vmatpush.msra.mxu0 %v66_v26  ;;  %133 = vmatpush.msra.mxu1 %v67_v27 }
  0x2c   :  { %114 = vmatpush.msra.mxu0 %v64_v28  ;;  %134 = vmatpush.msra.mxu1 %v65_v29 }
  0x2e   :  { %115 = vmatpush.msra.mxu0 %v62_v30  ;;  %135 = vmatpush.msra.mxu1 %v63_v31 }
  0x2f   :  { %116 = vmatmul.f32.vlgmr.msra.gmra.mxu0 %v61_v32  ;;  %136 = vmatmul.f32.vlgmr.msra.gmra.mxu1 %v61_v32 }
  0xac   :  { %v117_v36 = vpop.f32.mrf.mxu0  ;;  %v137_v37 = vpop.f32.mrf.mxu1 }
  0xad   :  { %v118_v38 = vadd.f32 %v117_v36, %v96_v34  ;;  %v138_v39 = vadd.f32 %v137_v37, %v97_v35 }
  0xaf   :  { %140 = vst [vmem:[#allocation8] sm:$0x3] %v118_v38 }
  0xb0   :  { %141 = vst [vmem:[#allocation9] sm:$0x3] %v138_v39  ;;  %152 = dma.vmem_to_hbm [thread:$0]  %s148_s2, 32, %s150_s7, [#allocation4]  }
  0xb1   :  { %163 = dma.vmem_to_hbm [thread:$0]  %s159_s9, 32, %s161_s12, [#allocation10]  }
  0xb2   :  { %307 = dma.done.wait [#allocation4], 32  }
  0xb3   :  { %308 = vsyncadd [#allocation4], 4294967264 }
  0xb4   :  { %309 = dma.done.wait [#allocation10], 32  }
  0xb5   :  { %310 = vsyncadd [#allocation10], 4294967264 }
  0xb6   :  { %172 = vsyncpa [#allocation3], 1 }
  0xb7   :  { %173 = vsyncpa [#allocation6], 1 }
  0xb8   :  { %174 = vsyncpa [#allocation4], 1 }
  0xb9   :  { %175 = vsyncpa [#allocation10], 1 }

</bundles_post_ra>
